<compile_context>
chip_gen: v7x
topology: tpu7x:2x2x1
jax: 0.10.0
libtpu: 0.0.40
codegen_flags: <defaults>
</compile_context>

<pallas_src>
import functools

import jax
import jax.numpy as jnp
from jax.experimental import pallas as pl
from jax.experimental.pallas import tpu as pltpu

LANE = 128                               # TPU lane width; hidden/output padded to this
MAX_TILE_M = 512                         # upper bound on batch rows per grid step
_BIAS_PAD = 8                            # sublane-aligned slot per bias row
P_ROWS = 3 * LANE + 3 * _BIAS_PAD        # packed parameter buffer rows (= 408)
_B_IN_ROW = 3 * LANE + 0 * _BIAS_PAD
_B_H_ROW = 3 * LANE + 1 * _BIAS_PAD
_B_OUT_ROW = 3 * LANE + 2 * _BIAS_PAD


def _critic_kernel(n_layers, in_dim, x_ref, p_ref, o_ref):
    """One batch tile of the critic MLP.

    x_ref: (tile_m, in_dim)   unpadded-feature states (batch rows only padded)
    p_ref: (P_ROWS, LANE)     packed, zero-padded weights + biases (VMEM-resident)
    o_ref: (1, 1, tile_m)     lane-dense critic values for this batch tile
    """
    tile_m = x_ref.shape[0]

    # input layer + tanh  — w_in read just-in-time, sliced to its real rows
    h = jnp.tanh(
        jnp.dot(x_ref[...], p_ref[:in_dim, :], preferred_element_type=jnp.float32)
        + p_ref[_B_IN_ROW:_B_IN_ROW + 1, :]
    )

    # Hoist the hidden-bias broadcast out of the unrolled loop (no CSE of
    # broadcast_in_dim in JAX traces).
    b_h = jnp.broadcast_to(p_ref[_B_H_ROW:_B_H_ROW + 1, :], (tile_m, LANE))

    # n_layers applications of the SAME hidden layer (shared weights), each
    # followed by tanh — matches the PyTorch forward loop.  n_layers is a
    # static Python int, so this unrolls at trace time.  The weight tile is
    # re-read from VMEM near each MXU push (keeps vreg pressure low).
    for _ in range(n_layers):
        h = jnp.tanh(
            jnp.dot(h, p_ref[LANE:2 * LANE, :], preferred_element_type=jnp.float32)
            + b_h
        )

    # output layer (no activation); only logical column 0 is meaningful
    out_full = (
        jnp.dot(h, p_ref[2 * LANE:3 * LANE, :], preferred_element_type=jnp.float32)
        + p_ref[_B_OUT_ROW:_B_OUT_ROW + 1, :]
    )                                                    # (tile_m, LANE)

    # Compact to one lane-dense row: XLU transpose, keep row 0 (= column 0).
    o_ref[0] = out_full.T[0:1, :]                        # (1, tile_m)


def _round_up(a, m):
    return (a + m - 1) // m * m


def _pick_tile(batch):
    """Largest tile <= MAX_TILE_M, but keep >= 2 grid steps when batch allows
    so v7x's two TensorCores both get work.  Tile is a multiple of 8."""
    tile = min(MAX_TILE_M, max(8, _round_up(pl.cdiv(batch, 2), 8)))
    n_tiles = pl.cdiv(batch, tile)
    return tile, n_tiles


@functools.partial(jax.jit, static_argnums=(2,))
def critic_forward_batched(x, packed_params, n_layers):
    """x: [B, input_size] float32 -> [B] critic values (Pallas kernel path)."""
    B, in_dim = x.shape
    if in_dim > LANE:
        raise ValueError(f"input_size {in_dim} > {LANE} not supported by packing")

    tile, n_tiles = _pick_tile(B)
    bp = n_tiles * tile

    xf = x.astype(jnp.float32)
    if bp != B:                      # pad only the batch dim (features untouched)
        xf = jnp.zeros((bp, in_dim), jnp.float32).at[:B, :].set(xf)

    out = pl.pallas_call(
        functools.partial(_critic_kernel, n_layers, in_dim),
        out_shape=jax.ShapeDtypeStruct((n_tiles, 1, tile), jnp.float32),
        grid=(n_tiles,),
        in_specs=[
            # batch tile of states; last block dim == full array dim (in_dim)
            pl.BlockSpec((tile, in_dim), lambda i: (i, 0)),
            # packed params: constant block index -> DMA'd once, stays resident
            pl.BlockSpec((P_ROWS, LANE), lambda i: (0, 0)),
        ],
        # one lane-dense (1, tile) row of values per grid step
        out_specs=pl.BlockSpec((1, 1, tile), lambda i: (i, 0, 0)),
        compiler_params=pltpu.CompilerParams(
            dimension_semantics=("parallel",),   # shard batch tiles over TCs (v7x)
        ),
    )(xf, packed_params)

    return out.reshape(bp)[:B]


@functools.partial(jax.jit, static_argnums=(2,))
def _critic_value_xla(x_row, params, n_layers):
    w_in, b_in, w_h, b_h, w_out, b_out = params
    h = jnp.tanh(x_row @ w_in + b_in)
    for _ in range(n_layers):
        h = jnp.tanh(h @ w_h + b_h)
    return (h @ w_out + b_out)[0, 0]


def critic_value(state, params, n_layers):
    """Single-state path matching PyTorch forward(state) + .item().

    B=1 is dispatch/launch-latency bound, so per the perf review it is routed
    through plain XLA instead of a padded Pallas MXU tile.
    """
    x = jnp.asarray(state, jnp.float32).reshape(1, -1)
    return float(_critic_value_xla(x, params, n_layers))


def init_params(key, input_size, hidden_size, output_size):
    """Logical (unpadded) params, mimicking nn.Linear's U(-1/sqrt(fan_in), ...)."""
    ks = jax.random.split(key, 6)

    def uniform(k, shape, fan_in):
        bound = 1.0 / jnp.sqrt(jnp.asarray(fan_in, jnp.float32))
        return jax.random.uniform(k, shape, jnp.float32, -bound, bound)

    w_in = uniform(ks[0], (input_size, hidden_size), input_size)
    b_in = uniform(ks[1], (hidden_size,), input_size)
    w_h = uniform(ks[2], (hidden_size, hidden_size), hidden_size)
    b_h = uniform(ks[3], (hidden_size,), hidden_size)
    w_out = uniform(ks[4], (hidden_size, output_size), hidden_size)
    b_out = uniform(ks[5], (output_size,), hidden_size)
    return (w_in, b_in, w_h, b_h, w_out, b_out)


def pack_params(params, input_size, hidden_size, output_size):
    """Pack all six params into one zero-padded (P_ROWS, LANE) f32 buffer.

    Zero padding is required for correctness: padded weight rows/cols and
    padded bias lanes are exactly 0, so tanh(0)=0 keeps padded hidden lanes
    at zero through every layer and they never leak into the output.
    """
    assert max(input_size, hidden_size, output_size) <= LANE
    # TODO(synk): generalize packing/tiling for hidden_size > 128.
    w_in, b_in, w_h, b_h, w_out, b_out = params
    buf = jnp.zeros((P_ROWS, LANE), jnp.float32)
    buf = buf.at[:input_size, :hidden_size].set(w_in)
    buf = buf.at[LANE:LANE + hidden_size, :hidden_size].set(w_h)
    buf = buf.at[2 * LANE:2 * LANE + hidden_size, :output_size].set(w_out)
    buf = buf.at[_B_IN_ROW, :hidden_size].set(b_in)
    buf = buf.at[_B_H_ROW, :hidden_size].set(b_h)
    buf = buf.at[_B_OUT_ROW, :output_size].set(b_out)
    return buf


def critic_ref(x, params, n_layers):
    """Pure-JAX reference of the same forward pass (batched)."""
    w_in, b_in, w_h, b_h, w_out, b_out = params
    h = jnp.tanh(x @ w_in + b_in)
    for _ in range(n_layers):
        h = jnp.tanh(h @ w_h + b_h)
    return (h @ w_out + b_out)[:, 0]


if __name__ == "__main__":
    # Pendulum-like critic: state dim 4, hidden 32, scalar value, 2 hidden passes.
    input_size, hidden_size, output_size, n_layers = 4, 32, 1, 2

    key = jax.random.PRNGKey(0)
    pkey, skey = jax.random.split(key)
    params = init_params(pkey, input_size, hidden_size, output_size)
    packed = jax.device_put(
        pack_params(params, input_size, hidden_size, output_size)
    )

    # Batched path (the perf path): 256 states -> 2 batch tiles of 128.
    B = 256
    states = jax.random.normal(skey, (B, input_size), dtype=jnp.float32)
    values = jax.block_until_ready(critic_forward_batched(states, packed, n_layers))
    ref = jax.block_until_ready(critic_ref(states, params, n_layers))
    assert values.shape == (B,)
    assert jnp.allclose(values, ref, atol=1e-5, rtol=1e-5), (values[:4], ref[:4])

    # A batch size that exercises batch-dim padding (B=50 -> 2 tiles of 32, bp=64).
    B2 = 50
    states2 = states[:B2]
    values2 = jax.block_until_ready(critic_forward_batched(states2, packed, n_layers))
    assert values2.shape == (B2,)
    assert jnp.allclose(values2, ref[:B2], atol=1e-5, rtol=1e-5)

    # Single-state path, matching the PyTorch module's forward/.item() semantics.
    v0 = critic_value(states[0], params, n_layers)
    assert abs(v0 - float(ref[0])) < 1e-5, (v0, float(ref[0]))

    print("KERNEL_OK")
</pallas_src>

<mosaic_0001>
module attributes {stable_mosaic.version = 11 : i64} {
  func.func @_critic_kernel(%arg0: i32, %arg1: memref<128x4xf32, #tpu.memory_space<vmem>>, %arg2: memref<408x128xf32, #tpu.memory_space<vmem>>, %arg3: memref<1x1x128xf32, #tpu.memory_space<vmem>>) attributes {dimension_semantics = [#tpu.dimension_semantics<parallel>], iteration_bounds = array<i64: 2>, scalar_prefetch = 0 : i64, scratch_operands = 0 : i64, tpu.core_type = #tpu.core_type<tc>, window_params = [{transform_indices = @transform_0, window_bounds = array<i64: 128, 4>}, {pipeline_mode = #tpu.pipeline_mode<synchronous>, transform_indices = @transform_1, window_bounds = array<i64: 408, 128>}, {transform_indices = @transform_2, window_bounds = array<i64: 1, 1, 128>}]} {
    %c0 = arith.constant 0 : index
    %c0_0 = arith.constant 0 : index
    %0 = vector.load %arg1[%c0, %c0_0] : memref<128x4xf32, #tpu.memory_space<vmem>>, vector<128x4xf32>
    %c0_1 = arith.constant 0 : index
    %c0_2 = arith.constant 0 : index
    %1 = vector.load %arg2[%c0_1, %c0_2] : memref<408x128xf32, #tpu.memory_space<vmem>>, vector<4x128xf32>
    %cst = arith.constant dense<0.000000e+00> : vector<128x128xf32>
    %2 = tpu.matmul %0, %1, %cst {dimension_numbers = #tpu.dot_dimension_numbers<[1], [0], [0], [1], [0, 0, 1, 1], [], []>} : vector<128x4xf32>, vector<4x128xf32>, vector<128x128xf32> -> vector<128x128xf32>
    %c384 = arith.constant 384 : index
    %c0_3 = arith.constant 0 : index
    %3 = vector.load %arg2[%c384, %c0_3] : memref<408x128xf32, #tpu.memory_space<vmem>>, vector<1x128xf32>
    %4 = vector.broadcast %3 : vector<1x128xf32> to vector<128x128xf32>
    %5 = arith.addf %2, %4 : vector<128x128xf32>
    %6 = math.tanh %5 : vector<128x128xf32>
    %c392 = arith.constant 392 : index
    %c0_4 = arith.constant 0 : index
    %7 = vector.load %arg2[%c392, %c0_4] : memref<408x128xf32, #tpu.memory_space<vmem>>, vector<1x128xf32>
    %8 = vector.shape_cast %7 : vector<1x128xf32> to vector<1x128xf32>
    %9 = vector.broadcast %8 : vector<1x128xf32> to vector<128x128xf32>
    %c128 = arith.constant 128 : index
    %c0_5 = arith.constant 0 : index
    %10 = vector.load %arg2[%c128, %c0_5] : memref<408x128xf32, #tpu.memory_space<vmem>>, vector<128x128xf32>
    %cst_6 = arith.constant dense<0.000000e+00> : vector<128x128xf32>
    %11 = tpu.matmul %6, %10, %cst_6 {dimension_numbers = #tpu.dot_dimension_numbers<[1], [0], [0], [1], [0, 0, 1, 1], [], []>} : vector<128x128xf32>, vector<128x128xf32>, vector<128x128xf32> -> vector<128x128xf32>
    %12 = arith.addf %11, %9 : vector<128x128xf32>
    %13 = math.tanh %12 : vector<128x128xf32>
    %c128_7 = arith.constant 128 : index
    %c0_8 = arith.constant 0 : index
    %14 = vector.load %arg2[%c128_7, %c0_8] : memref<408x128xf32, #tpu.memory_space<vmem>>, vector<128x128xf32>
    %cst_9 = arith.constant dense<0.000000e+00> : vector<128x128xf32>
    %15 = tpu.matmul %13, %14, %cst_9 {dimension_numbers = #tpu.dot_dimension_numbers<[1], [0], [0], [1], [0, 0, 1, 1], [], []>} : vector<128x128xf32>, vector<128x128xf32>, vector<128x128xf32> -> vector<128x128xf32>
    %16 = arith.addf %15, %9 : vector<128x128xf32>
    %17 = math.tanh %16 : vector<128x128xf32>
    %c256 = arith.constant 256 : index
    %c0_10 = arith.constant 0 : index
    %18 = vector.load %arg2[%c256, %c0_10] : memref<408x128xf32, #tpu.memory_space<vmem>>, vector<128x128xf32>
    %cst_11 = arith.constant dense<0.000000e+00> : vector<128x128xf32>
    %19 = tpu.matmul %17, %18, %cst_11 {dimension_numbers = #tpu.dot_dimension_numbers<[1], [0], [0], [1], [0, 0, 1, 1], [], []>} : vector<128x128xf32>, vector<128x128xf32>, vector<128x128xf32> -> vector<128x128xf32>
    %c400 = arith.constant 400 : index
    %c0_12 = arith.constant 0 : index
    %20 = vector.load %arg2[%c400, %c0_12] : memref<408x128xf32, #tpu.memory_space<vmem>>, vector<1x128xf32>
    %21 = vector.broadcast %20 : vector<1x128xf32> to vector<128x128xf32>
    %22 = arith.addf %19, %21 : vector<128x128xf32>
    %23 = tpu.transpose %22, [1, 0] : vector<128x128xf32> -> vector<128x128xf32>
    %24 = vector.extract_strided_slice %23 {offsets = [0, 0], sizes = [1, 128], strides = [1, 1]} : vector<128x128xf32> to vector<1x128xf32>
    %c0_13 = arith.constant 0 : index
    %c0_14 = arith.constant 0 : index
    %c0_15 = arith.constant 0 : index
    %25 = vector.load %arg3[%c0_13, %c0_14, %c0_15] : memref<1x1x128xf32, #tpu.memory_space<vmem>>, vector<1x1x128xf32>
    %26 = vector.shape_cast %25 : vector<1x1x128xf32> to vector<1x128xf32>
    %27 = vector.shape_cast %24 : vector<1x128xf32> to vector<1x1x128xf32>
    tpu.vector_store %arg3[%c0_13, %c0_14, %c0_15], %27 {strides = array<i32>} : memref<1x1x128xf32, #tpu.memory_space<vmem>>, vector<1x1x128xf32>,
    return
  }
  func.func @transform_0(%arg0: i32) -> (i32, i32) {
    %c0_i32 = arith.constant 0 : i32
    %c0_i32_0 = arith.constant 0 : i32
    return %arg0, %c0_i32 : i32, i32
  }
  func.func @transform_1(%arg0: i32) -> (i32, i32) {
    %c0_i32 = arith.constant 0 : i32
    %c0_i32_0 = arith.constant 0 : i32
    %c0_i32_1 = arith.constant 0 : i32
    return %c0_i32, %c0_i32_0 : i32, i32
  }
  func.func @transform_2(%arg0: i32) -> (i32, i32, i32) {
    %c0_i32 = arith.constant 0 : i32
    %c0_i32_0 = arith.constant 0 : i32
    %c0_i32_1 = arith.constant 0 : i32
    return %arg0, %c0_i32, %c0_i32_0 : i32, i32, i32
  }
}

</mosaic_0001>

<bundles_post_ra>
// kernel: critic_forward_batched.1
= control target key start
LH: loop header
LB: loop body
LE: loop exit
PB: predicated region body
PF: predicated region fallthrough
CT: control target
= control target key end

     0   :  { %7 = vsyncpa [#allocation3], 0  ;;  %s1977_s0 = inlined_call_operand.vmem [shape: f32[256,4], index: 0, kind: input, shape index: {}]   ;;  %s1978_s1 = inlined_call_operand.hbm [shape: f32[408,128], index: 1, kind: input, shape index: {}]   ;;  %s1979_s2 = inlined_call_operand.hbm [shape: f32[2,1,128], index: 2, kind: output, shape index: {}]  }
   0x1   :  { %8 = vsyncpa [#allocation4], 0 }
   0x2   :  { %10 = vsyncpa [#allocation4 + $0x1], 0  ;;  %s1729_s9 = smov 0   ;;  %s1731_s10 = smov 0  }
   0x3   :  { %s1733_s11 = smov 0   ;;  %s1735_s12 = smov 0  }
   0x4 LB: > { %s1750_s13 = sadd.s32 4294967295, %s1708_s12   ;;  %s1016_s14 = sadd.s32 4294967294, %s1708_s12   ;;  %s1708_s12 = sphi %s1735_s12, %s1995_s12   ;;  %s1704_s11 = sphi %s1733_s11, %s1994_s11   ;;  %s1700_s10 = sphi %s1731_s10, %s1993_s10   ;;  %s1696_s9 = sphi %s1729_s9, %s1992_s9  }
   0x5   : > { %s1754_s15 = sadd.s32 1, %s1708_s12   ;;  %s70_s16 = sadd.s32 1, %s1704_s11 }
   0x6   : > { %s67_s17 = ssub.s32 %s1708_s12, %s1754_s15  ;;  %p80_p0 = scmp.ne.s32.totalorder %s1704_s11, %s1700_s10 }
   0x7   : > { %p68_p1 = scmp.eq.s32.totalorder %s67_s17, 0  ;;  %p81_p2 = scmp.eq.s32.totalorder %s1750_s13, 1 }
   0x8   : > { %p86_p3 = scmp.ne.s32.totalorder %s1700_s10, %s1696_s9  ;;  %p87_p4 = scmp.eq.s32.totalorder %s1016_s14, 1 }
   0x9   : > { %s1765_s18 = scalar_select %p68_p1, %s1704_s11, %s70_s16  }
   0xa   : > { %p1767_p5 = por %p81_p2, %p80_p0  ;;  %p1771_p6 = por %p87_p4, %p86_p3 }
   0xb   : > { %p1017_p7 = scmp.ge.s32.totalorder %s1708_s12, 1  ;;  %p94_p8 = scmp.lt.s32.totalorder %s1708_s12, 3 }
   0xc   : > { %s1983_s19 = scalar_select %p1767_p5, 1, 0 }
   0xd   : > { %s1984_s20 = scalar_select %p1771_p6, 1, 0 }
   0xe   : > { %p1980_p9 = scmp.eq.s32.totalorder %s1750_s13, 0  ;;  %p1778_p10 = pnand %p1017_p7, %p94_p8 }
   0xf   : > { %s1710_s22 = smov [#allocation2]   ;;  %s1614_s27 = scalar_lea.hbm %s1978_s1, 6528 }
  0x10   : > { %s1985_s21 = scalar_select %p1778_p10, 1, 0 }
  0x11   : > { %s106_s23 = sshll.u32 %s1710_s22, 4  ;;  %p1472_p11 = pneg %p1778_p10  ;;  %s107_s23 = int_to_ptr.vmem [resolvable:$true] %s106_s23 }
  0x12   : > { %p1615_p13 = scmp.ne.s32.totalorder %s1978_s1, %s1614_s27  ;;  %p1621_p3 = scmp.lt.u32.totalorder %s1614_s27, %s1978_s1 }
  0x13   : > { %p1786_p12 = pnand %p1980_p9, %p1472_p11 }
  0x15   : > { %p1616_p0 = pneg %p1786_p12 }
  0x17   : > { %p1617_p1 = pnand %p1616_p0, %p1615_p13 }
  0x19   : > { %p1618_p2 = pneg %p1617_p1 }
  0x1b   : > { %p1623_p4 = pnand %p1621_p3, %p1618_p2 }
  0x1d   : > { %1626 = shalt.err (!%p1623_p4)
}
  0x1e   : > { %s1627_s4 = scalar_lea.vmem %s107_s23, 6528  ;;  %p1635_p9 = scmp.lt.s32.totalorder %s107_s23, %s107_s23 }
  0x1f   : > { %p1628_p7 = scmp.ne.s32.totalorder %s107_s23, %s1627_s4  ;;  %p1636_p6 = scmp.lt.s32.totalorder %s1627_s4, %s1627_s4 }
  0x21   : > { %p1630_p8 = pnand %p1628_p7, %p1616_p0  ;;  %p1637_p5 = por %p1636_p6, %p1635_p9 }
  0x23   : > { %p1631_p11 = pneg %p1630_p8 }
  0x25   : > { %p1638_p10 = pnand %p1637_p5, %p1631_p11 }
  0x27   : > { %1641 = shalt.err (!%p1638_p10)
}
  0x28   : > { %s1711_s5 = smov 128   ;;  %s1712_s6 = smov 8  }
  0x29   : > { %1475 = dma.hbm_to_vmem [thread:$0]  (!%p1786_p12), %s1978_s1, 6528, %s107_s23, [#allocation3], %s1711_s5, %s1711_s5, %s1712_s6  }
  0x2a   : > { %p1987_p13 = scmp.ne.s32.totalorder %s1985_s21, 0 }
  0x2b   : > { %p1988_p1 = scmp.eq.s32.totalorder (!%p1987_p13), %s1750_s13, 0 }
  0x2c   : > { %131 = sbr.rel (%p1987_p13) target bundleno = 1100 (0x44c), region = 28 }
  0x33   : > { %1687 = dma.done.wait (%p1988_p1), [#allocation3], 6528   ;;  %p1989_p0 = pmov %p1988_p1 }
  0x34   : > { %s1813_s14 = sshll.u32 %s1750_s13, 4  ;;  %vm229_vm0 = vcmask 1043456   ;;  %vm180_vm1 = vcmask 31744   ;;  %v174_v0 = vld [vmem:[#allocation2] sm:$0xf]  ;;  %v400_v7 = vld [vmem:[#allocation2 + $0x88] sm:$0xff] }
  0x35   : > { %1689 = vsyncadd (%p1989_p0), [#allocation3], 4294960768  ;;  %p153_p5 = scmp.lt.s32.totalorder %s1813_s14, 31  ;;  %1160 = vmatprep.subr.msk.mxu0 %vm229_vm0, %v174_v0  ;;  %v399_v6 = vld [vmem:[#allocation2 + $0x80] sm:$0xff]  ;;  %v401_v8 = vld [vmem:[#allocation2 + $0x90] sm:$0xff]  ;;  %s150_s13 = sand.u32 1, %s1700_s10  }
  0x36   : > { %1161 = vmatpush3.msk.msra.mxu0 %vm229_vm0, %v174_v0  ;;  %v402_v9 = vld [vmem:[#allocation2 + $0x98] sm:$0xff]  ;;  %v1354_v10 = vpack.c.bf16 %v400_v7, %v399_v6  ;;  %v403_v13 = vld [vmem:[#allocation2 + $0xa0] sm:$0xff]  ;;  %v404_v14 = vld [vmem:[#allocation2 + $0xa8] sm:$0xff]  ;;  %s151_s24 = scalar_lea.vmem [#allocation5], %s150_s13  ;;  %s1937_s28 = scalar_lea.hbm %s1979_s2, %s1813_s14 }
  0x37   : > { %s154_s16 = scalar_select %p153_p5, %s1813_s14, 31  ;;  %v1358_v11 = vpack.c.bf16 %v402_v9, %v401_v8  ;;  %v1362_v16 = vpack.c.bf16 %v404_v14, %v403_v13  ;;  %v405_v18 = vld [vmem:[#allocation2 + $0xb0] sm:$0xff]  ;;  %v406_v19 = vld [vmem:[#allocation2 + $0xb8] sm:$0xff]  ;;  %v407_v29 = vld [vmem:[#allocation2 + $0xc0] sm:$0xff] }
  0x38   : > { %1355 = vmatprep.subr.bf16.mxu1 %v1354_v10  ;;  %1387 = vmatprep.subr.bf16.mxu0 %v1354_v10  ;;  %v1366_v21 = vpack.c.bf16 %v406_v19, %v405_v18  ;;  %v408_v30 = vld [vmem:[#allocation2 + $0xc8] sm:$0xff]  ;;  %v409_v32 = vld [vmem:[#allocation2 + $0xd0] sm:$0xff]  ;;  %v410_v33 = vld [vmem:[#allocation2 + $0xd8] sm:$0xff]  ;;  %s949_s25 = sshll.u32 %s151_s24, 4  ;;  %s937_s29 = scalar_lea.sflag [#allocation4], %s150_s13  ;;  %s1931_s25 = int_to_ptr.vmem [resolvable:$true] %s949_s25 }
  0x39   : > { %s1023_s17 = sshll.u32 %s154_s16, 3  ;;  %1357 = vmatpush3.bf16.msra.mxu1 %v1354_v10  ;;  %v1370_v31 = vpack.c.bf16 %v408_v30, %v407_v29  ;;  %v1374_v34 = vpack.c.bf16 %v410_v33, %v409_v32  ;;  %v411_v35 = vld [vmem:[#allocation2 + $0xe0] sm:$0xff]  ;;  %v412_v36 = vld [vmem:[#allocation2 + $0xe8] sm:$0xff]  ;;  %v413_v38 = vld [vmem:[#allocation2 + $0xf0] sm:$0xff]  ;;  %s1642_s30 = scalar_lea.vmem %s1931_s25, 16 }
  0x3a   : > { %s1820_s21 = scalar_lea.vmem %s1977_s0, %s1023_s17  ;;  %1359 = vmatprep.subr.bf16.mxu1 %v1358_v11  ;;  %v1378_v37 = vpack.c.bf16 %v412_v36, %v411_v35  ;;  %v414_v39 = vld [vmem:[#allocation2 + $0xf8] sm:$0xff]  ;;  %v1854_v41 = vld [vmem:[#allocation2 + $0x180] ss:$0 sm:$0xff]  ;;  %v742_v33 = vld [vmem:[#allocation2 + $0x128] sm:$0xff]  ;;  %p1643_p6 = scmp.ne.s32.totalorder %s1931_s25, %s1642_s30 }
  0x3b   : > { %v158_v1 = vld [vmem:[%s1820_s21] sm:$0xff]  ;;  %v159_v2 = vld [vmem:[%s1820_s21 + $0x8] sm:$0xff]  ;;  %v160_v3 = vld [vmem:[%s1820_s21 + $0x10] sm:$0xff]  ;;  %v1382_v40 = vpack.c.bf16 %v414_v39, %v413_v38  ;;  %p1990_p9 = scmp.ne.s32.totalorder %s1983_s19, 0  ;;  %s1713_s3 = smov [#allocation5]  }
  0x3c   : > { %1162 = vmatprep.mubr.msk.f32.mxu0 %vm180_vm1, %v158_v1  ;;  %v161_v4 = vld [vmem:[%s1820_s21 + $0x18] sm:$0xff]  ;;  %v162_v5 = vld [vmem:[%s1820_s21 + $0x20] sm:$0xff]  ;;  %v163_v12 = vld [vmem:[%s1820_s21 + $0x28] sm:$0xff]  ;;  %s1646_s4 = sshll.u32 %s1713_s3, 4  ;;  %s1647_s4 = int_to_ptr.vmem [resolvable:$false] %s1646_s4 }
  0x3d   : > { %1163 = vmatmul.mubr.msk.f32.vlgmr.msra.gmra.mrb[0].mxu0 %vm180_vm1, %v159_v2  ;;  %v164_v15 = vld [vmem:[%s1820_s21 + $0x30] sm:$0xff]  ;;  %v165_v17 = vld [vmem:[%s1820_s21 + $0x38] sm:$0xff]  ;;  %v166_v20 = vld [vmem:[%s1820_s21 + $0x40] sm:$0xff]  ;;  %1361 = vmatpush3.bf16.msra.mxu1 %v1358_v11  ;;  %p1644_p10 = pnand %p1643_p6, %p1990_p9  ;;  %s1648_s5 = scalar_lea.vmem %s1647_s4, 32 }
  0x3e   : > { %1165 = vmatprep.mubr.msk.f32.mxu0 %vm180_vm1, %v160_v3  ;;  %1389 = vmatpush3.bf16.msra.mxu0 %v1354_v10  ;;  %v167_v22 = vld [vmem:[%s1820_s21 + $0x48] sm:$0xff]  ;;  %v168_v23 = vld [vmem:[%s1820_s21 + $0x50] sm:$0xff]  ;;  %v169_v24 = vld [vmem:[%s1820_s21 + $0x58] sm:$0xff]  ;;  %p1649_p2 = scmp.lt.s32.totalorder %s1931_s25, %s1647_s4  ;;  %p1650_p3 = scmp.lt.s32.totalorder %s1648_s5, %s1642_s30 }
  0x3f   : > { %1391 = vmatprep.subr.bf16.mxu0 %v1358_v11  ;;  %1363 = vmatprep.subr.bf16.mxu1 %v1362_v16  ;;  %v170_v25 = vld [vmem:[%s1820_s21 + $0x60] sm:$0xff]  ;;  %v171_v26 = vld [vmem:[%s1820_s21 + $0x68] sm:$0xff]  ;;  %v172_v27 = vld [vmem:[%s1820_s21 + $0x70] sm:$0xff]  ;;  %p1645_p12 = pneg %p1644_p10 }
  0x40   : > { %v173_v28 = vld [vmem:[%s1820_s21 + $0x78] sm:$0xff]  ;;  %v741_v32 = vld [vmem:[#allocation2 + $0x120] sm:$0xff]  ;;  %v743_v35 = vld [vmem:[#allocation2 + $0x130] sm:$0xff]  ;;  %p1651_p4 = por %p1650_p3, %p1649_p2 }
  0x41   : > { %1166 = vmatmul.mubr.msk.f32.gmra.mrb[2].mxu0 %vm180_vm1, %v161_v4  ;;  %1365 = vmatpush3.bf16.msra.mxu1 %v1362_v16  ;;  %v740_v30 = vld [vmem:[#allocation2 + $0x118] sm:$0xff]  ;;  %v745_v38 = vld [vmem:[#allocation2 + $0x140] sm:$0xff]  ;;  %v746_v39 = vld [vmem:[#allocation2 + $0x148] sm:$0xff] }
  0x42   : > { %1168 = vmatprep.mubr.msk.f32.mxu0 %vm180_vm1, %v162_v5  ;;  %1393 = vmatpush3.bf16.msra.mxu0 %v1358_v11  ;;  %v744_v36 = vld [vmem:[#allocation2 + $0x138] sm:$0xff]  ;;  %p1652_p7 = pnand %p1651_p4, %p1645_p12 }
  0x43   : > { %1395 = vmatprep.subr.bf16.mxu0 %v1362_v16  ;;  %1367 = vmatprep.subr.bf16.mxu1 %v1366_v21 }
  0x45   : > { %1169 = vmatmul.mubr.msk.f32.gmra.mrb[4].mxu0 %vm180_vm1, %v163_v12  ;;  %1369 = vmatpush3.bf16.msra.mxu1 %v1366_v21 }
  0x46   : > { %1171 = vmatprep.mubr.msk.f32.mxu0 %vm180_vm1, %v164_v15  ;;  %1397 = vmatpush3.bf16.msra.mxu0 %v1362_v16 }
  0x47   : > { %1399 = vmatprep.subr.bf16.mxu0 %v1366_v21  ;;  %1371 = vmatprep.subr.bf16.mxu1 %v1370_v31 }
  0x49   : > { %1172 = vmatmul.mubr.msk.f32.gmra.mrb[6].mxu0 %vm180_vm1, %v165_v17  ;;  %1373 = vmatpush3.bf16.msra.mxu1 %v1370_v31 }
  0x4a   : > { %1174 = vmatprep.mubr.msk.f32.mxu0 %vm180_vm1, %v166_v20  ;;  %1401 = vmatpush3.bf16.msra.mxu0 %v1366_v21 }
  0x4b   : > { %1403 = vmatprep.subr.bf16.mxu0 %v1370_v31  ;;  %1375 = vmatprep.subr.bf16.mxu1 %v1374_v34 }
  0x4d   : > { %1175 = vmatmul.mubr.msk.f32.gmra.mrb[8].mxu0 %vm180_vm1, %v167_v22  ;;  %1377 = vmatpush3.bf16.msra.mxu1 %v1374_v34 }
  0x4e   : > { %1177 = vmatprep.mubr.msk.f32.mxu0 %vm180_vm1, %v168_v23  ;;  %1405 = vmatpush3.bf16.msra.mxu0 %v1370_v31 }
  0x4f   : > { %1407 = vmatprep.subr.bf16.mxu0 %v1374_v34  ;;  %1379 = vmatprep.subr.bf16.mxu1 %v1378_v37 }
  0x51   : > { %1178 = vmatmul.mubr.msk.f32.gmra.mrb[10].mxu0 %vm180_vm1, %v169_v24  ;;  %1381 = vmatpush3.bf16.msra.mxu1 %v1378_v37 }
  0x52   : > { %1180 = vmatprep.mubr.msk.f32.mxu0 %vm180_vm1, %v170_v25  ;;  %1409 = vmatpush3.bf16.msra.mxu0 %v1374_v34  ;;  %v1875_v34 = vpack.c.bf16 %v742_v33, %v741_v32  ;;  %v751_v32 = vld [vmem:[#allocation2 + $0x170] sm:$0xff]  ;;  %v752_v33 = vld [vmem:[#allocation2 + $0x178] sm:$0xff] }
  0x53   : > { %1411 = vmatprep.subr.bf16.mxu0 %v1378_v37  ;;  %1383 = vmatprep.subr.bf16.mxu1 %v1382_v40 }
  0x55   : > { %1181 = vmatmul.mubr.msk.f32.gmra.mrb[12].mxu0 %vm180_vm1, %v171_v26  ;;  %1385 = vmatpush3.bf16.msra.mxu1 %v1382_v40  ;;  %v737_v26 = vld [vmem:[#allocation2 + $0x100] sm:$0xff] }
  0x56   : > { %1183 = vmatprep.mubr.msk.f32.mxu0 %vm180_vm1, %v172_v27  ;;  %1413 = vmatpush3.bf16.msra.mxu0 %v1378_v37  ;;  %v738_v27 = vld [vmem:[#allocation2 + $0x108] sm:$0xff]  ;;  %v1879_v37 = vpack.c.bf16 %v744_v36, %v743_v35 }
  0x57   : > { %1415 = vmatprep.subr.bf16.mxu0 %v1382_v40  ;;  %v1418_v29 = vpack.c.bf16 %v738_v27, %v737_v26  ;;  %v747_v26 = vld [vmem:[#allocation2 + $0x150] sm:$0xff]  ;;  %v748_v27 = vld [vmem:[#allocation2 + $0x158] sm:$0xff] }
  0x59   : > { %1184 = vmatmul.mubr.msk.f32.gmra.mrb[14].mxu0 %vm180_vm1, %v173_v28  ;;  %v739_v28 = vld [vmem:[#allocation2 + $0x110] sm:$0xff]  ;;  %1450 = vmatprep.subr.bf16.mxu1 %v1418_v29 }
  0x5a   : > { %1417 = vmatpush3.bf16.msra.mxu0 %v1382_v40  ;;  %v1872_v31 = vpack.c.bf16 %v740_v30, %v739_v28  ;;  %v1883_v40 = vpack.c.bf16 %v746_v39, %v745_v38  ;;  %v1438_v28 = vpack.c.bf16 %v748_v27, %v747_v26  ;;  %v750_v30 = vld [vmem:[#allocation2 + $0x168] sm:$0xff] }
  0x5b   : > { %1419 = vmatprep.subr.bf16.mxu0 %v1418_v29 }
 0x110   : > { %v1164_v42 = vpop.f32.mrb[0].mxu0 }
 0x111   : > { %v305_v43 = vadd.f32 %v1164_v42, %v1854_v41  ;;  %v299_v44 = vpop.f32.mrb[1].mxu0 }
 0x112   : > { %v300_v45 = vadd.f32 %v1854_v41, %v299_v44 }
 0x114   : > { %1518 = vtanh.f32 %v300_v45  ;;  %v1167_v46 = vpop.f32.mrb[2].mxu0 }
 0x115   : > { %1520 = vtanh.f32 %v305_v43  ;;  %v315_v47 = vadd.f32 %v1167_v46, %v1854_v41  ;;  %v309_v48 = vpop.f32.mrb[3].mxu0 }
 0x116   : > { %v310_v49 = vadd.f32 %v1854_v41, %v309_v48 }
 0x117   : > { %1522 = vtanh.f32 %v315_v47 }
 0x118   : > { %1524 = vtanh.f32 %v310_v49  ;;  %v1170_v50 = vpop.f32.mrb[4].mxu0 }
 0x119   : > { %v325_v51 = vadd.f32 %v1170_v50, %v1854_v41  ;;  %v319_v52 = vpop.f32.mrb[5].mxu0 }
 0x11a   : > { %v320_v53 = vadd.f32 %v1854_v41, %v319_v52 }
 0x11b   : > { %1526 = vtanh.f32 %v325_v51 }
 0x11c   : > { %1528 = vtanh.f32 %v320_v53  ;;  %v1173_v54 = vpop.f32.mrb[6].mxu0 }
 0x11d   : > { %v335_v55 = vadd.f32 %v1173_v54, %v1854_v41  ;;  %v329_v56 = vpop.f32.mrb[7].mxu0 }
 0x11e   : > { %v1519_v57 = vpop.eup %1518  ;;  %v330_v58 = vadd.f32 %v1854_v41, %v329_v56 }
 0x11f   : > { %v1521_v59 = vpop.eup %1520  ;;  %1218 = vmatprep.mubr.f32.mxu1 %v1519_v57  ;;  %1530 = vtanh.f32 %v335_v55 }
 0x120   : > { %1219 = vmatmul.mubr.f32.vlgmr.msra.gmra.mrb[0].mxu1 %v1521_v59  ;;  %1532 = vtanh.f32 %v330_v58  ;;  %v1176_v60 = vpop.f32.mrb[8].mxu0 }
 0x121   : > { %v1523_v61 = vpop.eup %1522  ;;  %v345_v62 = vadd.f32 %v1176_v60, %v1854_v41  ;;  %v339_v63 = vpop.f32.mrb[9].mxu0  ;;  %1458 = vmatpush3.bf16.msra.mxu1 %v1418_v29 }
 0x122   : > { %v1525_v0 = vpop.eup %1524  ;;  %v340_v1 = vadd.f32 %v1854_v41, %v339_v63  ;;  %1451 = vmatprep.subr.bf16.mxu1 %v1872_v31 }
 0x123   : > { %1221 = vmatprep.mubr.f32.mxu1 %v1525_v0  ;;  %1534 = vtanh.f32 %v345_v62 }
 0x124   : > { %1222 = vmatmul.mubr.f32.gmra.mrb[2].mxu1 %v1523_v61  ;;  %1536 = vtanh.f32 %v340_v1  ;;  %v1179_v2 = vpop.f32.mrb[10].mxu0 }
 0x125   : > { %v1527_v3 = vpop.eup %1526  ;;  %v355_v4 = vadd.f32 %v1179_v2, %v1854_v41  ;;  %v349_v5 = vpop.f32.mrb[11].mxu0  ;;  %1459 = vmatpush3.bf16.msra.mxu1 %v1872_v31 }
 0x126   : > { %v1529_v6 = vpop.eup %1528  ;;  %v350_v7 = vadd.f32 %v1854_v41, %v349_v5  ;;  %1452 = vmatprep.subr.bf16.mxu1 %v1875_v34 }
 0x127   : > { %1224 = vmatprep.mubr.f32.mxu1 %v1529_v6  ;;  %1538 = vtanh.f32 %v355_v4 }
 0x128   : > { %1225 = vmatmul.mubr.f32.gmra.mrb[4].mxu1 %v1527_v3  ;;  %1540 = vtanh.f32 %v350_v7  ;;  %v1182_v8 = vpop.f32.mrb[12].mxu0 }
 0x129   : > { %v1531_v9 = vpop.eup %1530  ;;  %v365_v10 = vadd.f32 %v1182_v8, %v1854_v41  ;;  %v359_v11 = vpop.f32.mrb[13].mxu0  ;;  %1460 = vmatpush3.bf16.msra.mxu1 %v1875_v34 }
 0x12a   : > { %v1533_v12 = vpop.eup %1532  ;;  %v360_v13 = vadd.f32 %v1854_v41, %v359_v11  ;;  %1453 = vmatprep.subr.bf16.mxu1 %v1879_v37 }
 0x12b   : > { %1227 = vmatprep.mubr.f32.mxu1 %v1533_v12  ;;  %1542 = vtanh.f32 %v365_v10 }
 0x12c   : > { %1228 = vmatmul.mubr.f32.gmra.mrb[6].mxu1 %v1531_v9  ;;  %1544 = vtanh.f32 %v360_v13  ;;  %v1185_v14 = vpop.f32.mrb[14].mxu0 }
 0x12d   : > { %v1535_v15 = vpop.eup %1534  ;;  %v375_v16 = vadd.f32 %v1185_v14, %v1854_v41  ;;  %v369_v17 = vpop.f32.mrb[15].mxu0  ;;  %1461 = vmatpush3.bf16.msra.mxu1 %v1879_v37 }
 0x12e   : > { %v1537_v18 = vpop.eup %1536  ;;  %v370_v19 = vadd.f32 %v1854_v41, %v369_v17  ;;  %1454 = vmatprep.subr.bf16.mxu1 %v1883_v40  ;;  %v1888_v41 = vld [vmem:[#allocation2 + $0x188] ss:$0 sm:$0xff] }
 0x12f   : > { %1230 = vmatprep.mubr.f32.mxu1 %v1537_v18  ;;  %1546 = vtanh.f32 %v375_v16 }
 0x130   : > { %1231 = vmatmul.mubr.f32.gmra.mrb[8].mxu1 %v1535_v15  ;;  %1548 = vtanh.f32 %v370_v19 }
 0x131   : > { %v1539_v20 = vpop.eup %1538  ;;  %1462 = vmatpush3.bf16.msra.mxu1 %v1883_v40 }
 0x132   : > { %v1541_v21 = vpop.eup %1540  ;;  %1455 = vmatprep.subr.bf16.mxu1 %v1438_v28 }
 0x133   : > { %1233 = vmatprep.mubr.f32.mxu1 %v1541_v21 }
 0x134   : > { %1234 = vmatmul.mubr.f32.gmra.mrb[10].mxu1 %v1539_v20 }
 0x135   : > { %v1543_v22 = vpop.eup %1542  ;;  %1463 = vmatpush3.bf16.msra.mxu1 %v1438_v28 }
 0x136   : > { %v1545_v23 = vpop.eup %1544 }
 0x137   : > { %1236 = vmatprep.mubr.f32.mxu1 %v1545_v23 }
 0x138   : > { %1237 = vmatmul.mubr.f32.gmra.mrb[12].mxu1 %v1543_v22 }
 0x139   : > { %v1547_v24 = vpop.eup %1546 }
 0x13a   : > { %v1549_v25 = vpop.eup %1548 }
 0x13b   : > { %1239 = vmatprep.mubr.f32.mxu1 %v1549_v25 }
 0x13c   : > { %1240 = vmatmul.mubr.f32.gmra.mrb[14].mxu1 %v1547_v24 }
 0x1f3   : > { %v1220_v42 = vpop.f32.mrb[0].mxu1 }
 0x1f4   : > { %v487_v43 = vadd.f32 %v1220_v42, %v1888_v41  ;;  %v481_v44 = vpop.f32.mrb[1].mxu1 }
 0x1f5   : > { %v482_v45 = vadd.f32 %v1888_v41, %v481_v44 }
 0x1f7   : > { %1550 = vtanh.f32 %v482_v45  ;;  %v1223_v46 = vpop.f32.mrb[2].mxu1 }
 0x1f8   : > { %1552 = vtanh.f32 %v487_v43  ;;  %v497_v47 = vadd.f32 %v1223_v46, %v1888_v41  ;;  %v491_v48 = vpop.f32.mrb[3].mxu1 }
 0x1f9   : > { %v492_v49 = vadd.f32 %v1888_v41, %v491_v48 }
 0x1fa   : > { %1554 = vtanh.f32 %v497_v47 }
 0x1fb   : > { %1556 = vtanh.f32 %v492_v49  ;;  %v1226_v50 = vpop.f32.mrb[4].mxu1 }
 0x1fc   : > { %v507_v51 = vadd.f32 %v1226_v50, %v1888_v41  ;;  %v501_v52 = vpop.f32.mrb[5].mxu1 }
 0x1fd   : > { %v502_v53 = vadd.f32 %v1888_v41, %v501_v52 }
 0x1fe   : > { %1558 = vtanh.f32 %v507_v51 }
 0x1ff   : > { %1560 = vtanh.f32 %v502_v53  ;;  %v1229_v54 = vpop.f32.mrb[6].mxu1 }
 0x200   : > { %v517_v55 = vadd.f32 %v1229_v54, %v1888_v41  ;;  %v511_v56 = vpop.f32.mrb[7].mxu1 }
 0x201   : > { %v1551_v57 = vpop.eup %1550  ;;  %v512_v58 = vadd.f32 %v1888_v41, %v511_v56 }
 0x202   : > { %v1553_v59 = vpop.eup %1552  ;;  %1274 = vmatprep.mubr.f32.mxu0 %v1551_v57  ;;  %1562 = vtanh.f32 %v517_v55 }
 0x203   : > { %1275 = vmatmul.mubr.f32.vlgmr.msra.gmra.mrb[16].mxu0 %v1553_v59  ;;  %1564 = vtanh.f32 %v512_v58  ;;  %v1232_v60 = vpop.f32.mrb[8].mxu1 }
 0x204   : > { %v1555_v61 = vpop.eup %1554  ;;  %v527_v62 = vadd.f32 %v1232_v60, %v1888_v41  ;;  %v521_v63 = vpop.f32.mrb[9].mxu1  ;;  %1421 = vmatpush3.bf16.msra.mxu0 %v1418_v29  ;;  %v749_v29 = vld [vmem:[#allocation2 + $0x160] sm:$0xff] }
 0x205   : > { %v1557_v0 = vpop.eup %1556  ;;  %v522_v1 = vadd.f32 %v1888_v41, %v521_v63  ;;  %1423 = vmatprep.subr.bf16.mxu0 %v1872_v31 }
 0x206   : > { %1277 = vmatprep.mubr.f32.mxu0 %v1557_v0  ;;  %1566 = vtanh.f32 %v527_v62 }
 0x207   : > { %1278 = vmatmul.mubr.f32.gmra.mrb[18].mxu0 %v1555_v61  ;;  %1568 = vtanh.f32 %v522_v1  ;;  %v1235_v2 = vpop.f32.mrb[10].mxu1 }
 0x208   : > { %v1559_v3 = vpop.eup %1558  ;;  %v537_v4 = vadd.f32 %v1235_v2, %v1888_v41  ;;  %v531_v5 = vpop.f32.mrb[11].mxu1  ;;  %1425 = vmatpush3.bf16.msra.mxu0 %v1872_v31  ;;  %v1442_v31 = vpack.c.bf16 %v750_v30, %v749_v29 }
 0x209   : > { %v1561_v6 = vpop.eup %1560  ;;  %v532_v7 = vadd.f32 %v1888_v41, %v531_v5  ;;  %1427 = vmatprep.subr.bf16.mxu0 %v1875_v34 }
 0x20a   : > { %1280 = vmatprep.mubr.f32.mxu0 %v1561_v6  ;;  %1570 = vtanh.f32 %v537_v4  ;;  %1456 = vmatprep.subr.bf16.mxu1 %v1442_v31 }
 0x20b   : > { %1281 = vmatmul.mubr.f32.gmra.mrb[20].mxu0 %v1559_v3  ;;  %1572 = vtanh.f32 %v532_v7  ;;  %v1238_v8 = vpop.f32.mrb[12].mxu1  ;;  %1464 = vmatpush3.bf16.msra.mxu1 %v1442_v31 }
 0x20c   : > { %v1563_v9 = vpop.eup %1562  ;;  %v547_v10 = vadd.f32 %v1238_v8, %v1888_v41  ;;  %v541_v11 = vpop.f32.mrb[13].mxu1  ;;  %1429 = vmatpush3.bf16.msra.mxu0 %v1875_v34  ;;  %v1446_v34 = vpack.c.bf16 %v752_v33, %v751_v32 }
 0x20d   : > { %v1565_v12 = vpop.eup %1564  ;;  %v542_v13 = vadd.f32 %v1888_v41, %v541_v11  ;;  %1431 = vmatprep.subr.bf16.mxu0 %v1879_v37 }
 0x20e   : > { %1283 = vmatprep.mubr.f32.mxu0 %v1565_v12  ;;  %1574 = vtanh.f32 %v547_v10  ;;  %1457 = vmatprep.subr.bf16.mxu1 %v1446_v34 }
 0x20f   : > { %1284 = vmatmul.mubr.f32.gmra.mrb[22].mxu0 %v1563_v9  ;;  %1576 = vtanh.f32 %v542_v13  ;;  %v1241_v14 = vpop.f32.mrb[14].mxu1  ;;  %1465 = vmatpush3.bf16.msra.mxu1 %v1446_v34 }
 0x210   : > { %v1567_v15 = vpop.eup %1566  ;;  %v557_v16 = vadd.f32 %v1241_v14, %v1888_v41  ;;  %v551_v17 = vpop.f32.mrb[15].mxu1  ;;  %1433 = vmatpush3.bf16.msra.mxu0 %v1879_v37 }
 0x211   : > { %v1569_v18 = vpop.eup %1568  ;;  %v552_v19 = vadd.f32 %v1888_v41, %v551_v17  ;;  %1435 = vmatprep.subr.bf16.mxu0 %v1883_v40 }
 0x212   : > { %1286 = vmatprep.mubr.f32.mxu0 %v1569_v18  ;;  %1578 = vtanh.f32 %v557_v16 }
 0x213   : > { %1287 = vmatmul.mubr.f32.gmra.mrb[24].mxu0 %v1567_v15  ;;  %1580 = vtanh.f32 %v552_v19 }
 0x214   : > { %v1571_v20 = vpop.eup %1570  ;;  %1437 = vmatpush3.bf16.msra.mxu0 %v1883_v40 }
 0x215   : > { %v1573_v21 = vpop.eup %1572  ;;  %1439 = vmatprep.subr.bf16.mxu0 %v1438_v28 }
 0x216   : > { %1289 = vmatprep.mubr.f32.mxu0 %v1573_v21 }
 0x217   : > { %1290 = vmatmul.mubr.f32.gmra.mrb[26].mxu0 %v1571_v20  ;;  %v1043_v20 = vld [vmem:[#allocation2 + $0x190] ss:$0 sm:$0xff] }
 0x218   : > { %v1575_v22 = vpop.eup %1574  ;;  %1441 = vmatpush3.bf16.msra.mxu0 %v1438_v28 }
 0x219   : > { %v1577_v23 = vpop.eup %1576  ;;  %1443 = vmatprep.subr.bf16.mxu0 %v1442_v31 }
 0x21a   : > { %1292 = vmatprep.mubr.f32.mxu0 %v1577_v23 }
 0x21b   : > { %1293 = vmatmul.mubr.f32.gmra.mrb[28].mxu0 %v1575_v22 }
 0x21c   : > { %v1579_v24 = vpop.eup %1578  ;;  %1445 = vmatpush3.bf16.msra.mxu0 %v1442_v31 }
 0x21d   : > { %v1581_v25 = vpop.eup %1580  ;;  %1447 = vmatprep.subr.bf16.mxu0 %v1446_v34 }
 0x21e   : > { %1295 = vmatprep.mubr.f32.mxu0 %v1581_v25 }
 0x21f   : > { %1296 = vmatmul.mubr.f32.gmra.mrb[30].mxu0 %v1579_v24 }
 0x220   : > { %1449 = vmatpush3.bf16.msra.mxu0 %v1446_v34 }
 0x2d6   : > { %v1276_v35 = vpop.f32.mrb[16].mxu0 }
 0x2d7   : > { %v648_v36 = vadd.f32 %v1276_v35, %v1888_v41  ;;  %v642_v37 = vpop.f32.mrb[17].mxu0 }
 0x2d8   : > { %v643_v38 = vadd.f32 %v1888_v41, %v642_v37 }
 0x2da   : > { %1582 = vtanh.f32 %v643_v38  ;;  %v1279_v39 = vpop.f32.mrb[18].mxu0 }
 0x2db   : > { %1584 = vtanh.f32 %v648_v36  ;;  %v658_v40 = vadd.f32 %v1279_v39, %v1888_v41  ;;  %v652_v42 = vpop.f32.mrb[19].mxu0 }
 0x2dc   : > { %v653_v43 = vadd.f32 %v1888_v41, %v652_v42 }
 0x2de   : > { %1586 = vtanh.f32 %v653_v43  ;;  %v1282_v44 = vpop.f32.mrb[20].mxu0 }
 0x2df   : > { %1588 = vtanh.f32 %v658_v40  ;;  %v668_v45 = vadd.f32 %v1282_v44, %v1888_v41  ;;  %v662_v46 = vpop.f32.mrb[21].mxu0 }
 0x2e0   : > { %v663_v47 = vadd.f32 %v1888_v41, %v662_v46 }
 0x2e1   : > { %1590 = vtanh.f32 %v668_v45 }
 0x2e2   : > { %1592 = vtanh.f32 %v663_v47  ;;  %v1285_v48 = vpop.f32.mrb[22].mxu0 }
 0x2e3   : > { %v678_v49 = vadd.f32 %v1285_v48, %v1888_v41  ;;  %v672_v50 = vpop.f32.mrb[23].mxu0 }
 0x2e4   : > { %v1583_v51 = vpop.eup %1582  ;;  %v673_v52 = vadd.f32 %v1888_v41, %v672_v50 }
 0x2e5   : > { %v1585_v53 = vpop.eup %1584  ;;  %1330 = vmatprep.mubr.f32.mxu0 %v1583_v51  ;;  %1594 = vtanh.f32 %v678_v49 }
 0x2e6   : > { %1331 = vmatmul.mubr.f32.vlgmr.msra.gmra.mrb[32].mxu0 %v1585_v53  ;;  %1596 = vtanh.f32 %v673_v52  ;;  %v1288_v54 = vpop.f32.mrb[24].mxu0 }
 0x2e7   : > { %v688_v55 = vadd.f32 %v1288_v54, %v1888_v41  ;;  %v682_v56 = vpop.f32.mrb[25].mxu0 }
 0x2e8   : > { %v1587_v57 = vpop.eup %1586  ;;  %v683_v58 = vadd.f32 %v1888_v41, %v682_v56 }
 0x2e9   : > { %v1589_v59 = vpop.eup %1588  ;;  %1333 = vmatprep.mubr.f32.mxu0 %v1587_v57  ;;  %1598 = vtanh.f32 %v688_v55 }
 0x2ea   : > { %1334 = vmatmul.mubr.f32.gmra.mrb[34].mxu0 %v1589_v59  ;;  %1600 = vtanh.f32 %v683_v58  ;;  %v1291_v60 = vpop.f32.mrb[26].mxu0 }
 0x2eb   : > { %v1591_v61 = vpop.eup %1590  ;;  %v698_v62 = vadd.f32 %v1291_v60, %v1888_v41  ;;  %v692_v63 = vpop.f32.mrb[27].mxu0 }
 0x2ec   : > { %v1593_v0 = vpop.eup %1592  ;;  %v693_v1 = vadd.f32 %v1888_v41, %v692_v63 }
 0x2ed   : > { %1336 = vmatprep.mubr.f32.mxu0 %v1593_v0  ;;  %1602 = vtanh.f32 %v698_v62 }
 0x2ee   : > { %1337 = vmatmul.mubr.f32.gmra.mrb[36].mxu0 %v1591_v61  ;;  %1604 = vtanh.f32 %v693_v1  ;;  %v1294_v2 = vpop.f32.mrb[28].mxu0 }
 0x2ef   : > { %v1595_v3 = vpop.eup %1594  ;;  %v708_v4 = vadd.f32 %v1294_v2, %v1888_v41  ;;  %v702_v5 = vpop.f32.mrb[29].mxu0 }
 0x2f0   : > { %v1597_v6 = vpop.eup %1596  ;;  %v703_v7 = vadd.f32 %v1888_v41, %v702_v5 }
 0x2f1   : > { %1339 = vmatprep.mubr.f32.mxu1 %v1597_v6  ;;  %1606 = vtanh.f32 %v708_v4 }
 0x2f2   : > { %1340 = vmatmul.mubr.f32.vlgmr.msra.gmra.mrb[16].mxu1 %v1595_v3  ;;  %1608 = vtanh.f32 %v703_v7  ;;  %v1297_v8 = vpop.f32.mrb[30].mxu0 }
 0x2f3   : > { %v1599_v9 = vpop.eup %1598  ;;  %v718_v10 = vadd.f32 %v1297_v8, %v1888_v41  ;;  %v712_v11 = vpop.f32.mrb[31].mxu0 }
 0x2f4   : > { %v1601_v12 = vpop.eup %1600  ;;  %v713_v13 = vadd.f32 %v1888_v41, %v712_v11 }
 0x2f5   : > { %1342 = vmatprep.mubr.f32.mxu1 %v1601_v12  ;;  %1610 = vtanh.f32 %v718_v10 }
 0x2f6   : > { %1343 = vmatmul.mubr.f32.gmra.mrb[18].mxu1 %v1599_v9  ;;  %1612 = vtanh.f32 %v713_v13 }
 0x2f7   : > { %v1603_v14 = vpop.eup %1602 }
 0x2f8   : > { %v1605_v15 = vpop.eup %1604 }
 0x2f9   : > { %1345 = vmatprep.mubr.f32.mxu1 %v1605_v15 }
 0x2fa   : > { %1346 = vmatmul.mubr.f32.gmra.mrb[20].mxu1 %v1603_v14 }
 0x2fb   : > { %v1607_v16 = vpop.eup %1606 }
 0x2fc   : > { %v1609_v17 = vpop.eup %1608 }
 0x2fd   : > { %1348 = vmatprep.mubr.f32.mxu1 %v1609_v17 }
 0x2fe   : > { %1349 = vmatmul.mubr.f32.gmra.mrb[22].mxu1 %v1607_v16 }
 0x2ff   : > { %v1611_v18 = vpop.eup %1610 }
 0x300   : > { %v1613_v19 = vpop.eup %1612 }
 0x301   : > { %1351 = vmatprep.mubr.f32.mxu1 %v1613_v19 }
 0x302   : > { %1352 = vmatmul.mubr.f32.gmra.mrb[24].mxu1 %v1611_v18 }
 0x3b9   : > { %v1332_v21 = vpop.f32.mrb[32].mxu0 }
 0x3ba   : > { %v824_v22 = vpop.f32.mrb[33].mxu0  ;;  %v830_v25 = vadd.f32 %v1332_v21, %v1043_v20 }
 0x3bb   : > { %v825_v41 = vadd.f32 %v1043_v20, %v824_v22 }
 0x3bd   : > { %v1335_v23 = vpop.f32.mrb[34].mxu0  ;;  %903 = vxpose.xlu0.b32.start [1/16] (narrow) %v825_v41, 8 }
 0x3be   : > { %v834_v24 = vpop.f32.mrb[35].mxu0  ;;  %v840_v31 = vadd.f32 %v1335_v23, %v1043_v20 }
 0x3bf   : > { %v835_v28 = vadd.f32 %v1043_v20, %v834_v24 }
 0x3c1   : > { %904 = vxpose.xlu0.b32.cont [2/16] (narrow) %v830_v25, 8  ;;  %v1338_v26 = vpop.f32.mrb[36].mxu0 }
 0x3c2   : > { %v844_v27 = vpop.f32.mrb[37].mxu0  ;;  %v850_v37 = vadd.f32 %v1338_v26, %v1043_v20 }
 0x3c3   : > { %v845_v34 = vadd.f32 %v1043_v20, %v844_v27 }
 0x3c5   : > { %905 = vxpose.xlu0.b32.cont [3/16] (narrow) %v835_v28, 8  ;;  %v1341_v29 = vpop.f32.mrb[16].mxu1 }
 0x3c6   : > { %v854_v30 = vpop.f32.mrb[17].mxu1  ;;  %v860_v44 = vadd.f32 %v1341_v29, %v1043_v20 }
 0x3c7   : > { %v855_v40 = vadd.f32 %v1043_v20, %v854_v30 }
 0x3c9   : > { %906 = vxpose.xlu0.b32.cont [4/16] (narrow) %v840_v31, 8  ;;  %v1344_v32 = vpop.f32.mrb[18].mxu1 }
 0x3ca   : > { %v864_v33 = vpop.f32.mrb[19].mxu1  ;;  %v870_v46 = vadd.f32 %v1344_v32, %v1043_v20 }
 0x3cb   : > { %v865_v45 = vadd.f32 %v1043_v20, %v864_v33 }
 0x3cd   : > { %907 = vxpose.xlu0.b32.cont [5/16] (narrow) %v845_v34, 8  ;;  %v1347_v35 = vpop.f32.mrb[20].mxu1 }
 0x3ce   : > { %v874_v36 = vpop.f32.mrb[21].mxu1  ;;  %v880_v48 = vadd.f32 %v1347_v35, %v1043_v20 }
 0x3cf   : > { %v875_v47 = vadd.f32 %v1043_v20, %v874_v36 }
 0x3d1   : > { %908 = vxpose.xlu0.b32.cont [6/16] (narrow) %v850_v37, 8  ;;  %v1350_v38 = vpop.f32.mrb[22].mxu1 }
 0x3d2   : > { %v884_v39 = vpop.f32.mrb[23].mxu1  ;;  %v890_v50 = vadd.f32 %v1350_v38, %v1043_v20 }
 0x3d3   : > { %v885_v49 = vadd.f32 %v1043_v20, %v884_v39 }
 0x3d5   : > { %909 = vxpose.xlu0.b32.cont [7/16] (narrow) %v855_v40, 8  ;;  %v1353_v42 = vpop.f32.mrb[24].mxu1 }
 0x3d6   : > { %v894_v43 = vpop.f32.mrb[25].mxu1  ;;  %v900_v52 = vadd.f32 %v1353_v42, %v1043_v20 }
 0x3d7   : > { %v895_v51 = vadd.f32 %v1043_v20, %v894_v43 }
 0x3d9   : > { %910 = vxpose.xlu0.b32.cont [8/16] (narrow) %v860_v44, 8 }
 0x3dd   : > { %911 = vxpose.xlu0.b32.cont [9/16] (narrow) %v865_v45, 8 }
 0x3e1   : > { %912 = vxpose.xlu0.b32.cont [10/16] (narrow) %v870_v46, 8 }
 0x3e5   : > { %913 = vxpose.xlu0.b32.cont [11/16] (narrow) %v875_v47, 8 }
 0x3e9   : > { %914 = vxpose.xlu0.b32.cont [12/16] (narrow) %v880_v48, 8 }
 0x3ed   : > { %915 = vxpose.xlu0.b32.cont [13/16] (narrow) %v885_v49, 8 }
 0x3f1   : > { %916 = vxpose.xlu0.b32.cont [14/16] (narrow) %v890_v50, 8 }
 0x3f5   : > { %917 = vxpose.xlu0.b32.cont [15/16] (narrow) %v895_v51, 8 }
 0x3f9   : > { %918 = vxpose.xlu0.b32.end [16/16] (narrow) %v900_v52, 8 }
 0x43d   : > { %v919_v53 = vpop.trf.xlu0 }
 0x43e   : > { %935 = vst [vmem:[%s151_s24] sm:$0x1] %v919_v53 }
 0x43f   : > { %1655 = shalt.err (!%p1652_p7)
}
 0x440   : > { %s1656_s6 = scalar_lea.hbm %s1937_s28, 16  ;;  %s1660_s14 = scalar_lea.hbm %s1979_s2, 32 }
 0x441   : > { %p1657_p8 = scmp.ne.s32.totalorder %s1937_s28, %s1656_s6  ;;  %p1661_p1 = scmp.lt.u32.totalorder %s1937_s28, %s1979_s2 }
 0x442   : > { %p1662_p0 = scmp.lt.u32.totalorder %s1660_s14, %s1656_s6  ;;  %p1664_p6 = scmp.lt.u32.totalorder %s1656_s6, %s1937_s28 }
 0x443   : > { %p1658_p11 = pnand %p1657_p8, %p1990_p9 }
 0x444   : > { %p1663_p5 = por %p1662_p0, %p1661_p1 }
 0x445   : > { %p1659_p13 = pneg %p1658_p11 }
 0x446   : > { %p1665_p10 = por %p1664_p6, %p1663_p5 }
 0x448   : > { %p1666_p12 = pnand %p1665_p10, %p1659_p13 }
 0x44a   : > { %1669 = shalt.err (!%p1666_p12)
}
 0x44b   : > { %1470 = dma.vmem_to_hbm [thread:$0]  (%p1990_p9), %s1931_s25, 16, %s1937_s28, %s937_s29  }
 0x44c PF: > { %p1482_p2 = scmp.ge.s32.totalorder %s1708_s12, 2  ;;  %s961_s22 = sand.u32 1, %s1696_s9  }
 0x44d   : > { %p1991_p3 = scmp.ne.s32.totalorder %s1984_s20, 0  ;;  %s962_s23 = scalar_lea.sflag [#allocation4], %s961_s22 }
 0x44f   : > { %p1477_p4 = pnand %p1482_p2, %p1991_p3 }
 0x451   : > { %1691 = dma.done.wait (!%p1477_p4), %s962_s23, 16  }
 0x452   : > { %1693 = vsyncadd (!%p1477_p4), %s962_s23, 4294967280  ;;  %p13_p7 = scmp.ge.s32.totalorder %s1754_s15, 4   ;;  %s1992_s9 = smov %s1700_s10 }
 0x453   : > { %s1993_s10 = smov %s1704_s11  ;;  %s1994_s11 = smov %s1765_s18 }
 0x454   : > { %s1995_s12 = smov %s1754_s15  ;;  %15 = sbr.rel (!%p13_p7) target bundleno = 4 (0x4), region = 68 }
 0x45b   :  { %966 = vsyncpa [#allocation3], 1 }
 0x45c   :  { %968 = vsyncpa [#allocation3 + $0x1], 1 }
 0x45d   :  { %969 = vsyncpa [#allocation4], 1 }
 0x45e   :  { %971 = vsyncpa [#allocation4 + $0x1], 1 }

</bundles_post_ra>
